<compile_context>
chip_gen: v5e
topology: v5e:2x2
jax: 0.10.0
libtpu: 0.0.40
codegen_flags: <defaults>
</compile_context>

<pallas_src>
from functools import lru_cache, partial

import jax
import jax.numpy as jnp
from jax.experimental import pallas as pl
from jax.experimental.pallas import tpu as pltpu

LN_EPS = 1e-5  # torch.nn.LayerNorm default


# --------------------------------------------------------------------------- #
# Kernel
# --------------------------------------------------------------------------- #
def grn_kernel(d_true, x_ref, w1_ref, b1_ref, w2_ref, b2_ref,
               gamma_ref, beta_ref, o_ref):
    x = x_ref[...]                                   # [tm, Dp]
    x_f32 = x.astype(jnp.float32)

    # fc1 + ReLU: MXU matmul (operands in weight dtype), f32 accumulation.
    h = jnp.dot(x.astype(w1_ref.dtype), w1_ref[...],
                preferred_element_type=jnp.float32)
    h = jnp.maximum(h + b1_ref[...], 0.0)            # [tm, Hp]

    # Dropout: eval-mode identity (see module TODO above).

    # fc2: cast the f32 accumulator to the weight dtype for the MXU operand.
    out = jnp.dot(h.astype(w2_ref.dtype), w2_ref[...],
                  preferred_element_type=jnp.float32)
    out = out + b2_ref[...]                           # [tm, Dp]

    # Sigmoid gating (EUP) + residual (VPU), all in f32.
    y = x_f32 + out * jax.nn.sigmoid(out)

    # LayerNorm over the true feature width d_true (padded lanes masked out).
    lane = jax.lax.broadcasted_iota(jnp.int32, y.shape, 1)
    valid = lane < d_true
    y = jnp.where(valid, y, 0.0)
    inv_d = jnp.float32(1.0 / d_true)
    mean = jnp.sum(y, axis=-1, keepdims=True) * inv_d
    cent = jnp.where(valid, y - mean, 0.0)
    var = jnp.sum(cent * cent, axis=-1, keepdims=True) * inv_d
    y_norm = cent * jax.lax.rsqrt(var + LN_EPS)
    o_ref[...] = (y_norm * gamma_ref[...] + beta_ref[...]).astype(o_ref.dtype)


# --------------------------------------------------------------------------- #
# Sizing helpers
# --------------------------------------------------------------------------- #
def _round_up(v, m):
    return -(-v // m) * m


def _tile_bytes(rows, cols, itemsize):
    # Account for (8, 128) vreg tiling / VMEM padding.
    return _round_up(max(rows, 1), 8) * _round_up(max(cols, 1), 128) * itemsize


def _pick_tm(M):
    # Large row tiles amortize the ~0.35us per-grid-step overhead; with D, H
    # padded to 128 a (tm, 128) f32 tile is only tm/2 KiB so VMEM is nowhere
    # near the budget even on v7x (64 MiB).  Clamp so the 1-D "parallel" grid
    # keeps at least 2 steps when M allows it (v7x has 2 TensorCores).
    if M <= 8:
        return 8
    half = _round_up(-(-M // 2), 8)
    return max(min(1024, half), 8)


def _vmem_cap_bytes():
    try:
        return int(pltpu.get_tpu_info().vmem_capacity_bytes)
    except Exception:
        return 64 << 20  # conservative: v7x per-TC physical VMEM


def _vmem_limit_bytes(tm, Dp, Hp, io_itemsize, w_itemsize):
    io = 2 * 2 * _tile_bytes(tm, Dp, io_itemsize)                 # x in + y out, double-buffered
    w = 2 * (_tile_bytes(Dp, Hp, w_itemsize) + _tile_bytes(Hp, Dp, w_itemsize))
    small = 2 * (_tile_bytes(1, Hp, 4) + 3 * _tile_bytes(1, Dp, 4))
    interm = 2 * _tile_bytes(tm, Hp, 4) + 3 * _tile_bytes(tm, Dp, 4)
    need = io + w + small + interm
    cap = _vmem_cap_bytes()
    return int(min(max(need * 3 // 2 + (4 << 20), 16 << 20), cap * 3 // 4))


def _default_mxu_dtype():
    # bf16 MXU operands on v6e/v7x (f32 matmul is multi-pass there and doubles
    # resident weight VMEM / HBM weight traffic); keep f32 operands on v5e and
    # unknown chips for tighter numerics.
    try:
        kind = jax.devices()[0].device_kind.lower()
    except Exception:
        return jnp.float32
    if "v6" in kind or "v7" in kind:
        return jnp.bfloat16
    return jnp.float32


_DEFAULT_MXU_DTYPE = _default_mxu_dtype()


# --------------------------------------------------------------------------- #
# pallas_call builder (cached per static shape/dtype/tile config)
# --------------------------------------------------------------------------- #
@lru_cache(maxsize=None)
def _build_call(Mp, Dp, Hp, d_true, out_dtype_name, io_itemsize, w_itemsize, tm):
    out_dtype = jnp.dtype(out_dtype_name)
    grid = (Mp // tm,)

    def const_spec(shape):
        # Constant-index blocks (weights/biases stay resident across the grid).
        return pl.BlockSpec(shape, lambda i: (0,) * len(shape))

    in_specs = [
        pl.BlockSpec((tm, Dp), lambda i: (i, 0)),   # x tile (pipelined over rows)
        const_spec((Dp, Hp)),                       # W1
        const_spec((1, Hp)),                        # b1
        const_spec((Hp, Dp)),                       # W2
        const_spec((1, Dp)),                        # b2
        const_spec((1, Dp)),                        # LayerNorm gamma
        const_spec((1, Dp)),                        # LayerNorm beta
    ]
    out_specs = pl.BlockSpec((tm, Dp), lambda i: (i, 0))

    cost = pl.CostEstimate(
        flops=4 * Mp * Dp * Hp + 14 * Mp * Dp,
        transcendentals=Mp * Dp + Mp,                       # sigmoid + rsqrt
        bytes_accessed=(2 * Mp * Dp * io_itemsize           # x in, y out
                        + 2 * Dp * Hp * w_itemsize          # W1 + W2
                        + (Hp + 3 * Dp) * 4),               # b1, b2, gamma, beta
    )

    return pl.pallas_call(
        partial(grn_kernel, d_true),
        out_shape=jax.ShapeDtypeStruct((Mp, Dp), out_dtype),
        grid_spec=pltpu.PrefetchScalarGridSpec(
            num_scalar_prefetch=0,
            grid=grid,
            in_specs=in_specs,
            out_specs=out_specs,
        ),
        compiler_params=pltpu.CompilerParams(
            dimension_semantics=("parallel",),
            vmem_limit_bytes=_vmem_limit_bytes(tm, Dp, Hp, io_itemsize, w_itemsize),
        ),
        cost_estimate=cost,
    )


# --------------------------------------------------------------------------- #
# Wrapper
# --------------------------------------------------------------------------- #
def _pad2d(a, rows, cols):
    r, c = a.shape
    if r == rows and c == cols:
        return a
    return jnp.pad(a, ((0, rows - r), (0, cols - c)))


def gated_residual_network(x2d, w1, b1, w2, b2, gamma, beta, *, tm=None, mxu_dtype=None):
    """x2d: [M, D]. w1: [D, H], b1: [1, H], w2: [H, D], b2/gamma/beta: [1, D].

    Output dtype follows x2d.dtype (bf16 activations halve x/y HBM traffic);
    the elementwise tail is always computed in f32 inside the kernel.
    """
    M, D = x2d.shape
    H = w1.shape[1]
    if mxu_dtype is None:
        mxu_dtype = _DEFAULT_MXU_DTYPE

    Dp = _round_up(D, 128)
    Hp = _round_up(H, 128)
    if tm is None:
        tm = _pick_tm(M)
    tm = max(_round_up(min(tm, max(M, 1)), 8), 8)
    Mp = _round_up(M, tm)

    # Zero-pad to lane-dense shapes.  Padded hidden columns are exactly zero
    # (zero W1 cols / b1), padded feature columns of `out` and `x` are exactly
    # zero (zero W2 cols / b2 / x pad), so the residual+gate in padded lanes is
    # zero and LayerNorm over the true D (masked in-kernel) is exact.
    xp = _pad2d(x2d, Mp, Dp)
    w1p = _pad2d(w1, Dp, Hp).astype(mxu_dtype)
    b1p = _pad2d(b1, 1, Hp).astype(jnp.float32)
    w2p = _pad2d(w2, Hp, Dp).astype(mxu_dtype)
    b2p = _pad2d(b2, 1, Dp).astype(jnp.float32)
    gp = _pad2d(gamma, 1, Dp).astype(jnp.float32)
    bp = _pad2d(beta, 1, Dp).astype(jnp.float32)

    fn = _build_call(
        Mp, Dp, Hp, D,
        jnp.dtype(x2d.dtype).name,
        jnp.dtype(x2d.dtype).itemsize,
        jnp.dtype(mxu_dtype).itemsize,
        tm,
    )
    yp = fn(xp, w1p, b1p, w2p, b2p, gp, bp)
    return yp[:M, :D]


# --------------------------------------------------------------------------- #
# Parameter init (mirrors the PyTorch module) and pure-JAX reference
# --------------------------------------------------------------------------- #
def init_params(key, input_dim, hidden_dim):
    k1, k2, k3, k4 = jax.random.split(key, 4)
    bound1 = 1.0 / float(input_dim) ** 0.5
    w1 = jax.random.uniform(k1, (input_dim, hidden_dim), jnp.float32, -bound1, bound1)
    b1 = jax.random.uniform(k2, (1, hidden_dim), jnp.float32, -bound1, bound1)
    bound2 = 1.0 / float(hidden_dim) ** 0.5
    w2 = jax.random.uniform(k3, (hidden_dim, input_dim), jnp.float32, -bound2, bound2)
    b2 = jax.random.uniform(k4, (1, input_dim), jnp.float32, -bound2, bound2)
    gamma = jnp.ones((1, input_dim), jnp.float32)
    beta = jnp.zeros((1, input_dim), jnp.float32)
    return w1, b1, w2, b2, gamma, beta


def grn_reference(x2d, w1, b1, w2, b2, gamma, beta):
    h = jnp.maximum(x2d @ w1 + b1, 0.0)
    out = h @ w2 + b2
    y = x2d + out * jax.nn.sigmoid(out)
    mean = y.mean(-1, keepdims=True)
    var = ((y - mean) ** 2).mean(-1, keepdims=True)
    return ((y - mean) / jnp.sqrt(var + LN_EPS)) * gamma + beta


# --------------------------------------------------------------------------- #
# Demo / self-test
# --------------------------------------------------------------------------- #
if __name__ == "__main__":
    key = jax.random.PRNGKey(0)
    k_x, k_p = jax.random.split(key)

    batch, seq, input_dim, hidden_dim = 2, 8, 32, 64
    x = jax.random.normal(k_x, (batch, seq, input_dim), jnp.float32)
    params = init_params(k_p, input_dim, hidden_dim)

    x2d = x.reshape(-1, input_dim)
    ref = grn_reference(x2d, *params)

    # 1) f32-MXU path: tight check against the reference.
    grn_f32 = jax.jit(partial(gated_residual_network, mxu_dtype=jnp.float32))
    out_f32 = jax.block_until_ready(grn_f32(x2d, *params))
    assert jnp.allclose(out_f32, ref, atol=1e-4, rtol=1e-4), "f32 kernel mismatch vs reference"

    # 2) Auto path: bf16 MXU operands on v6e/v7x (loose tolerance), f32 on v5e.
    grn_auto = jax.jit(gated_residual_network)
    out_auto = jax.block_until_ready(grn_auto(x2d, *params))
    assert jnp.allclose(out_auto, ref, atol=1e-1, rtol=1e-1), "auto-MXU kernel mismatch"

    # 3) bf16 activation IO path (halves x/y HBM traffic); tail stays f32 in-kernel.
    out_bf16 = jax.block_until_ready(grn_auto(x2d.astype(jnp.bfloat16), *params))
    assert jnp.allclose(out_bf16.astype(jnp.float32), ref, atol=1e-1, rtol=1e-1), \
        "bf16-activation kernel mismatch"

    out3d = out_auto.reshape(batch, seq, input_dim)
    jax.block_until_ready(out3d)
    print("KERNEL_OK")
</pallas_src>

<mosaic_0001>
module attributes {stable_mosaic.version = 11 : i64} {
  func.func @grn_kernel(%arg0: i32, %arg1: memref<8x128xf32, #tpu.memory_space<vmem>>, %arg2: memref<128x128xf32, #tpu.memory_space<vmem>>, %arg3: memref<1x128xf32, #tpu.memory_space<vmem>>, %arg4: memref<128x128xf32, #tpu.memory_space<vmem>>, %arg5: memref<1x128xf32, #tpu.memory_space<vmem>>, %arg6: memref<1x128xf32, #tpu.memory_space<vmem>>, %arg7: memref<1x128xf32, #tpu.memory_space<vmem>>, %arg8: memref<8x128xf32, #tpu.memory_space<vmem>>) attributes {dimension_semantics = [#tpu.dimension_semantics<parallel>], iteration_bounds = array<i64: 2>, scalar_prefetch = 0 : i64, scratch_operands = 0 : i64, tpu.core_type = #tpu.core_type<tc>, window_params = [{transform_indices = @transform_0, window_bounds = array<i64: 8, 128>}, {pipeline_mode = #tpu.pipeline_mode<synchronous>, transform_indices = @transform_1, window_bounds = array<i64: 128, 128>}, {pipeline_mode = #tpu.pipeline_mode<synchronous>, transform_indices = @transform_2, window_bounds = array<i64: 1, 128>}, {pipeline_mode = #tpu.pipeline_mode<synchronous>, transform_indices = @transform_3, window_bounds = array<i64: 128, 128>}, {pipeline_mode = #tpu.pipeline_mode<synchronous>, transform_indices = @transform_4, window_bounds = array<i64: 1, 128>}, {pipeline_mode = #tpu.pipeline_mode<synchronous>, transform_indices = @transform_5, window_bounds = array<i64: 1, 128>}, {pipeline_mode = #tpu.pipeline_mode<synchronous>, transform_indices = @transform_6, window_bounds = array<i64: 1, 128>}, {transform_indices = @transform_7, window_bounds = array<i64: 8, 128>}]} {
    %c0 = arith.constant 0 : index
    %c0_0 = arith.constant 0 : index
    %0 = vector.load %arg1[%c0, %c0_0] : memref<8x128xf32, #tpu.memory_space<vmem>>, vector<8x128xf32>
    %c0_1 = arith.constant 0 : index
    %c0_2 = arith.constant 0 : index
    %1 = vector.load %arg2[%c0_1, %c0_2] : memref<128x128xf32, #tpu.memory_space<vmem>>, vector<128x128xf32>
    %cst = arith.constant dense<0.000000e+00> : vector<8x128xf32>
    %2 = tpu.matmul %0, %1, %cst {dimension_numbers = #tpu.dot_dimension_numbers<[1], [0], [0], [1], [0, 0, 1, 1], [], []>} : vector<8x128xf32>, vector<128x128xf32>, vector<8x128xf32> -> vector<8x128xf32>
    %c0_3 = arith.constant 0 : index
    %c0_4 = arith.constant 0 : index
    %3 = vector.load %arg3[%c0_3, %c0_4] : memref<1x128xf32, #tpu.memory_space<vmem>>, vector<1x128xf32>
    %4 = vector.broadcast %3 : vector<1x128xf32> to vector<8x128xf32>
    %5 = arith.addf %2, %4 : vector<8x128xf32>
    %cst_5 = arith.constant 0.000000e+00 : f32
    %6 = vector.broadcast %cst_5 : f32 to vector<8x128xf32>
    %7 = arith.maximumf %5, %6 : vector<8x128xf32>
    %c0_6 = arith.constant 0 : index
    %c0_7 = arith.constant 0 : index
    %8 = vector.load %arg4[%c0_6, %c0_7] : memref<128x128xf32, #tpu.memory_space<vmem>>, vector<128x128xf32>
    %cst_8 = arith.constant dense<0.000000e+00> : vector<8x128xf32>
    %9 = tpu.matmul %7, %8, %cst_8 {dimension_numbers = #tpu.dot_dimension_numbers<[1], [0], [0], [1], [0, 0, 1, 1], [], []>} : vector<8x128xf32>, vector<128x128xf32>, vector<8x128xf32> -> vector<8x128xf32>
    %c0_9 = arith.constant 0 : index
    %c0_10 = arith.constant 0 : index
    %10 = vector.load %arg5[%c0_9, %c0_10] : memref<1x128xf32, #tpu.memory_space<vmem>>, vector<1x128xf32>
    %11 = vector.broadcast %10 : vector<1x128xf32> to vector<8x128xf32>
    %12 = arith.addf %9, %11 : vector<8x128xf32>
    %13 = arith.negf %12 : vector<8x128xf32>
    %14 = math.exp %13 : vector<8x128xf32>
    %cst_11 = arith.constant 1.000000e+00 : f32
    %15 = vector.broadcast %cst_11 : f32 to vector<8x128xf32>
    %16 = arith.addf %15, %14 : vector<8x128xf32>
    %17 = arith.divf %15, %16 : vector<8x128xf32>
    %18 = arith.mulf %12, %17 : vector<8x128xf32>
    %19 = arith.addf %0, %18 : vector<8x128xf32>
    %20 = tpu.iota {dimensions = array<i32: 1>} : vector<8x128xi32>
    %c32_i32 = arith.constant 32 : i32
    %21 = vector.broadcast %c32_i32 : i32 to vector<8x128xi32>
    %22 = arith.cmpi slt, %20, %21 : vector<8x128xi32>
    %cst_12 = arith.constant 0.000000e+00 : f32
    %23 = vector.broadcast %cst_12 : f32 to vector<8x128xf32>
    %24 = arith.select %22, %19, %23 : vector<8x128xi1>, vector<8x128xf32>
    %cst_13 = arith.constant dense<0.000000e+00> : vector<8xf32>
    %25 = vector.multi_reduction <add>, %24, %cst_13 [1] : vector<8x128xf32> to vector<8xf32>
    %26 = vector.shape_cast %25 : vector<8xf32> to vector<8x1xf32>
    %cst_14 = arith.constant 3.125000e-02 : f32
    %27 = vector.broadcast %cst_14 : f32 to vector<8x1xf32>
    %28 = arith.mulf %26, %27 : vector<8x1xf32>
    %29 = vector.broadcast %28 : vector<8x1xf32> to vector<8x128xf32>
    %30 = arith.subf %24, %29 : vector<8x128xf32>
    %cst_15 = arith.constant 0.000000e+00 : f32
    %31 = vector.broadcast %cst_15 : f32 to vector<8x128xf32>
    %32 = arith.select %22, %30, %31 : vector<8x128xi1>, vector<8x128xf32>
    %33 = arith.mulf %32, %32 : vector<8x128xf32>
    %cst_16 = arith.constant dense<0.000000e+00> : vector<8xf32>
    %34 = vector.multi_reduction <add>, %33, %cst_16 [1] : vector<8x128xf32> to vector<8xf32>
    %35 = vector.shape_cast %34 : vector<8xf32> to vector<8x1xf32>
    %cst_17 = arith.constant 3.125000e-02 : f32
    %36 = vector.broadcast %cst_17 : f32 to vector<8x1xf32>
    %37 = arith.mulf %35, %36 : vector<8x1xf32>
    %cst_18 = arith.constant 9.99999974E-6 : f32
    %38 = vector.broadcast %cst_18 : f32 to vector<8x1xf32>
    %39 = arith.addf %37, %38 : vector<8x1xf32>
    %40 = math.rsqrt %39 : vector<8x1xf32>
    %41 = vector.broadcast %40 : vector<8x1xf32> to vector<8x128xf32>
    %42 = arith.mulf %32, %41 : vector<8x128xf32>
    %c0_19 = arith.constant 0 : index
    %c0_20 = arith.constant 0 : index
    %43 = vector.load %arg6[%c0_19, %c0_20] : memref<1x128xf32, #tpu.memory_space<vmem>>, vector<1x128xf32>
    %44 = vector.broadcast %43 : vector<1x128xf32> to vector<8x128xf32>
    %45 = arith.mulf %42, %44 : vector<8x128xf32>
    %c0_21 = arith.constant 0 : index
    %c0_22 = arith.constant 0 : index
    %46 = vector.load %arg7[%c0_21, %c0_22] : memref<1x128xf32, #tpu.memory_space<vmem>>, vector<1x128xf32>
    %47 = vector.broadcast %46 : vector<1x128xf32> to vector<8x128xf32>
    %48 = arith.addf %45, %47 : vector<8x128xf32>
    %c0_23 = arith.constant 0 : index
    %c0_24 = arith.constant 0 : index
    %49 = vector.load %arg8[%c0_23, %c0_24] : memref<8x128xf32, #tpu.memory_space<vmem>>, vector<8x128xf32>
    tpu.vector_store %arg8[%c0_23, %c0_24], %48 {strides = array<i32>} : memref<8x128xf32, #tpu.memory_space<vmem>>, vector<8x128xf32>,
    return
  }
  func.func @transform_0(%arg0: i32) -> (i32, i32) {
    %c0_i32 = arith.constant 0 : i32
    %c0_i32_0 = arith.constant 0 : i32
    return %arg0, %c0_i32 : i32, i32
  }
  func.func @transform_1(%arg0: i32) -> (i32, i32) {
    %c0_i32 = arith.constant 0 : i32
    %c0_i32_0 = arith.constant 0 : i32
    %c0_i32_1 = arith.constant 0 : i32
    return %c0_i32, %c0_i32_0 : i32, i32
  }
  func.func @transform_2(%arg0: i32) -> (i32, i32) {
    %c0_i32 = arith.constant 0 : i32
    %c0_i32_0 = arith.constant 0 : i32
    %c0_i32_1 = arith.constant 0 : i32
    return %c0_i32, %c0_i32_0 : i32, i32
  }
  func.func @transform_3(%arg0: i32) -> (i32, i32) {
    %c0_i32 = arith.constant 0 : i32
    %c0_i32_0 = arith.constant 0 : i32
    %c0_i32_1 = arith.constant 0 : i32
    return %c0_i32, %c0_i32_0 : i32, i32
  }
  func.func @transform_4(%arg0: i32) -> (i32, i32) {
    %c0_i32 = arith.constant 0 : i32
    %c0_i32_0 = arith.constant 0 : i32
    %c0_i32_1 = arith.constant 0 : i32
    return %c0_i32, %c0_i32_0 : i32, i32
  }
  func.func @transform_5(%arg0: i32) -> (i32, i32) {
    %c0_i32 = arith.constant 0 : i32
    %c0_i32_0 = arith.constant 0 : i32
    %c0_i32_1 = arith.constant 0 : i32
    return %c0_i32, %c0_i32_0 : i32, i32
  }
  func.func @transform_6(%arg0: i32) -> (i32, i32) {
    %c0_i32 = arith.constant 0 : i32
    %c0_i32_0 = arith.constant 0 : i32
    %c0_i32_1 = arith.constant 0 : i32
    return %c0_i32, %c0_i32_0 : i32, i32
  }
  func.func @transform_7(%arg0: i32) -> (i32, i32) {
    %c0_i32 = arith.constant 0 : i32
    %c0_i32_0 = arith.constant 0 : i32
    return %arg0, %c0_i32 : i32, i32
  }
}

</mosaic_0001>

<bundles_post_ra>
// kernel: gated_residual_network.1
= control target key start
LH: loop header
LB: loop body
LE: loop exit
PB: predicated region body
PF: predicated region fallthrough
CT: control target
= control target key end

     0   :  { %12 = vsyncpa [#allocation3], 0  ;;  %s845_s0 = inlined_call_operand.vmem [shape: f32[16,128], index: 0, kind: input, shape index: {}]   ;;  %s846_s1 = inlined_call_operand.vmem [shape: f32[128,128], index: 1, kind: input, shape index: {}]   ;;  %s847_s2 = inlined_call_operand.vmem [shape: f32[1,128], index: 2, kind: input, shape index: {}]   ;;  %s848_s3 = inlined_call_operand.vmem [shape: f32[128,128], index: 3, kind: input, shape index: {}]   ;;  %s849_s4 = inlined_call_operand.vmem [shape: f32[1,128], index: 4, kind: input, shape index: {}]   ;;  %s850_s5 = inlined_call_operand.vmem [shape: f32[1,128], index: 5, kind: input, shape index: {}]   ;;  %s851_s6 = inlined_call_operand.vmem [shape: f32[1,128], index: 6, kind: input, shape index: {}]   ;;  %s852_s7 = inlined_call_operand.hbm [shape: f32[16,128], index: 7, kind: output, shape index: {}]  }
   0x1   :  { %14 = vsyncpa [#allocation3 + $0x1], 0  ;;  %s652_s24 = smov 0   ;;  %s654_s25 = smov 0  }
   0x2   :  { %s656_s26 = smov 0   ;;  %s658_s27 = smov 0  }
   0x3 LB: > { %s673_s28 = sadd.s32 4294967295, %s610_s27   ;;  %s488_s29 = sadd.s32 4294967294, %s610_s27   ;;  %s610_s27 = sphi %s658_s27, %s858_s27   ;;  %s606_s26 = sphi %s656_s26, %s857_s26   ;;  %s602_s25 = sphi %s654_s25, %s856_s25   ;;  %s598_s24 = sphi %s652_s24, %s855_s24  }
   0x4   : > { %s677_s30 = sadd.s32 1, %s610_s27   ;;  %s179_s8 = sadd.s32 1, %s606_s26 }
   0x5   : > { %s176_s9 = ssub.s32 %s610_s27, %s677_s30  ;;  %p189_p0 = scmp.ne.s32.totalorder %s606_s26, %s602_s25 }
   0x6   : > { %p177_p1 = scmp.eq.s32.totalorder %s176_s9, 0  ;;  %p190_p2 = scmp.eq.s32.totalorder %s673_s28, 1 }
   0x7   : > { %p195_p3 = scmp.ne.s32.totalorder %s602_s25, %s598_s24  ;;  %p196_p4 = scmp.eq.s32.totalorder %s488_s29, 1 }
   0x8   : > { %s688_s10 = scalar_select %p177_p1, %s606_s26, %s179_s8  }
   0x9   : > { %p690_p5 = por %p190_p2, %p189_p0  ;;  %p694_p6 = por %p196_p4, %p195_p3 }
   0xa   : > { %p491_p7 = scmp.ge.s32.totalorder %s610_s27, 1  ;;  %p239_p8 = scmp.lt.s32.totalorder %s610_s27, 3 }
   0xc   : > { %p240_p9 = pnand %p491_p7, %p239_p8 }
   0xd   : > { %p270_p10 = scmp.lt.s32.totalorder (!%p240_p9), %s673_s28, 1  ;;  %s267_s16 = sand.u32 (!%p240_p9), 1, %s602_s25  }
   0xe   : > { %243 = sbr.rel (%p240_p9) target bundleno = 612 (0x264), region = 48  ;;  %s492_s17 = sshll.u32 (!%p240_p9), %s267_s16, 3 }
   0xf   : > { %s496_s19 = sshll.u32 (!%p240_p9), %s673_s28, 3  ;;  %s269_s13 = scalar_lea.vmem (!%p240_p9), [#allocation2], %s492_s17 }
  0x10   : > { %s424_s29 = scalar_lea.hbm (!%p240_p9), %s852_s7, %s496_s19  ;;  %s568_s22 = scalar_lea.hbm (!%p240_p9), %s852_s7, 16 }
  0x11   : > { %s428_s14 = sshll.u32 (!%p240_p9), %s424_s29, 4  ;;  %s429_s14 = int_to_ptr.hbm [resolvable:$true] %s428_s14 }
  0x13   : > { %v290_v0 = vld [vmem:[%s846_s1 + $0x78] sm:$0xff]  ;;  %v289_v1 = vld [vmem:[%s846_s1 + $0x70] sm:$0xff]  ;;  %v288_v2 = vld [vmem:[%s846_s1 + $0x68] sm:$0xff]  ;;  %s271_s23 = scalar_select %p270_p10, %s673_s28, 1  ;;  %v377_v47 = vlaneseq }
  0x14   : > { %295 = vmatpush.msra.mxu0 %v290_v0  ;;  %v287_v3 = vld [vmem:[%s846_s1 + $0x60] sm:$0xff]  ;;  %v331_v4 = vld [vmem:[%s848_s3 + $0x78] sm:$0xff]  ;;  %v330_v5 = vld [vmem:[%s848_s3 + $0x70] sm:$0xff]  ;;  %s426_s28 = sshll.u32 %s269_s13, 4  ;;  %s427_s28 = int_to_ptr.vmem [resolvable:$true] %s426_s28 }
  0x15   : > { %v286_v6 = vld [vmem:[%s846_s1 + $0x58] sm:$0xff]  ;;  %336 = vmatpush.msra.mxu1 %v331_v4  ;;  %v329_v7 = vld [vmem:[%s848_s3 + $0x68] sm:$0xff]  ;;  %v285_v8 = vld [vmem:[%s846_s1 + $0x50] sm:$0xff]  ;;  %s493_s18 = sshll.u32 %s271_s23, 3  ;;  %v378_v52 = vand.u32 127, %v377_v47  ;;  %s414_s23 = scalar_lea.sflag [#allocation3], %s267_s16 }
  0x16   : > { %296 = vmatpush.msra.mxu0 %v289_v1  ;;  %v328_v9 = vld [vmem:[%s848_s3 + $0x60] sm:$0xff]  ;;  %v284_v10 = vld [vmem:[%s846_s1 + $0x48] sm:$0xff]  ;;  %v327_v11 = vld [vmem:[%s848_s3 + $0x58] sm:$0xff]  ;;  %s273_s15 = scalar_lea.vmem %s845_s0, %s493_s18 }
  0x17   : > { %337 = vmatpush.msra.mxu1 %v330_v5  ;;  %v283_v12 = vld [vmem:[%s846_s1 + $0x40] sm:$0xff]  ;;  %v326_v13 = vld [vmem:[%s848_s3 + $0x50] sm:$0xff]  ;;  %v282_v14 = vld [vmem:[%s846_s1 + $0x38] sm:$0xff]  ;;  %vm379_vm4 = vcmp.lt.s32.totalorder %v378_v52, 32 }
  0x18   : > { %297 = vmatpush.msra.mxu0 %v288_v2  ;;  %v325_v15 = vld [vmem:[%s848_s3 + $0x48] sm:$0xff]  ;;  %v281_v16 = vld [vmem:[%s846_s1 + $0x30] sm:$0xff]  ;;  %v324_v17 = vld [vmem:[%s848_s3 + $0x40] sm:$0xff] }
  0x19   : > { %338 = vmatpush.msra.mxu1 %v329_v7  ;;  %v280_v18 = vld [vmem:[%s846_s1 + $0x28] sm:$0xff]  ;;  %v323_v19 = vld [vmem:[%s848_s3 + $0x38] sm:$0xff]  ;;  %v279_v20 = vld [vmem:[%s846_s1 + $0x20] sm:$0xff] }
  0x1a   : > { %298 = vmatpush.msra.mxu0 %v287_v3  ;;  %v322_v21 = vld [vmem:[%s848_s3 + $0x30] sm:$0xff]  ;;  %v278_v22 = vld [vmem:[%s846_s1 + $0x18] sm:$0xff]  ;;  %v321_v23 = vld [vmem:[%s848_s3 + $0x28] sm:$0xff] }
  0x1b   : > { %339 = vmatpush.msra.mxu1 %v328_v9  ;;  %v277_v24 = vld [vmem:[%s846_s1 + $0x10] sm:$0xff]  ;;  %v320_v25 = vld [vmem:[%s848_s3 + $0x20] sm:$0xff]  ;;  %v276_v26 = vld [vmem:[%s846_s1 + $0x8] sm:$0xff] }
  0x1c   : > { %299 = vmatpush.msra.mxu0 %v286_v6  ;;  %v319_v27 = vld [vmem:[%s848_s3 + $0x18] sm:$0xff]  ;;  %v275_v28 = vld [vmem:[%s846_s1] sm:$0xff]  ;;  %v318_v30 = vld [vmem:[%s848_s3 + $0x10] sm:$0xff] }
  0x1d   : > { %340 = vmatpush.msra.mxu1 %v327_v11  ;;  %v274_v29 = vld [vmem:[%s273_s15] sm:$0xff]  ;;  %v317_v31 = vld [vmem:[%s848_s3 + $0x8] sm:$0xff]  ;;  %s562_s15 = sshra.s32 %s429_s14, 4  ;;  %s563_s15 = int_to_ptr.hbm [resolvable:$true] %s562_s15 }
  0x1e   : > { %300 = vmatpush.msra.mxu0 %v285_v8  ;;  %v316_v32 = vld [vmem:[%s848_s3] sm:$0xff]  ;;  %s564_s20 = scalar_lea.hbm %s563_s15, 8  ;;  %p569_p0 = scmp.lt.s32.totalorder %s563_s15, %s852_s7 }
  0x1f   : > { %341 = vmatpush.msra.mxu1 %v326_v13  ;;  %v538_v33 = vld [vmem:[%s847_s2] ss:$0 sm:$0xff]  ;;  %p565_p11 = scmp.ne.s32.totalorder %s563_s15, %s564_s20  ;;  %p570_p1 = scmp.lt.s32.totalorder %s568_s22, %s564_s20 }
  0x20   : > { %301 = vmatpush.msra.mxu0 %v284_v10  ;;  %v539_v37 = vld [vmem:[%s849_s4] ss:$0 sm:$0xff] }
  0x21   : > { %342 = vmatpush.msra.mxu1 %v325_v15  ;;  %v540_v8 = vld [vmem:[%s850_s5] ss:$0 sm:$0xff]  ;;  %p566_p12 = pnand %p565_p11, %p690_p5  ;;  %p571_p2 = por %p570_p1, %p569_p0 }
  0x22   : > { %302 = vmatpush.msra.mxu0 %v283_v12  ;;  %v541_v11 = vld [vmem:[%s851_s6] ss:$0 sm:$0xff] }
  0x23   : > { %343 = vmatpush.msra.mxu1 %v324_v17  ;;  %p567_p13 = pneg %p566_p12 }
  0x24   : > { %303 = vmatpush.msra.mxu0 %v282_v14 }
  0x25   : > { %344 = vmatpush.msra.mxu1 %v323_v19  ;;  %p572_p3 = pnand %p571_p2, %p567_p13 }
  0x26   : > { %304 = vmatpush.msra.mxu0 %v281_v16 }
  0x27   : > { %345 = vmatpush.msra.mxu1 %v322_v21 }
  0x28   : > { %305 = vmatpush.msra.mxu0 %v280_v18 }
  0x29   : > { %346 = vmatpush.msra.mxu1 %v321_v23 }
  0x2a   : > { %306 = vmatpush.msra.mxu0 %v279_v20 }
  0x2b   : > { %347 = vmatpush.msra.mxu1 %v320_v25 }
  0x2c   : > { %307 = vmatpush.msra.mxu0 %v278_v22 }
  0x2d   : > { %348 = vmatpush.msra.mxu1 %v319_v27 }
  0x2e   : > { %308 = vmatpush.msra.mxu0 %v277_v24 }
  0x2f   : > { %349 = vmatpush.msra.mxu1 %v318_v30 }
  0x30   : > { %309 = vmatpush.msra.mxu0 %v276_v26 }
  0x31   : > { %350 = vmatpush.msra.mxu1 %v317_v31 }
  0x32   : > { %310 = vmatpush.msra.mxu0 %v275_v28 }
  0x33   : > { %311 = vmatmul.f32.vlgmr.msra.gmra.mxu0 %v274_v29  ;;  %351 = vmatpush.msra.mxu1 %v316_v32 }
  0xb0   : > { %v312_v34 = vpop.f32.mrf.mxu0 }
  0xb1   : > { %v313_v35 = vadd.f32 %v538_v33, %v312_v34 }
  0xb3   : > { %v315_v36 = vmax.f32 %v313_v35, 0.0 }
  0xb5   : > { %352 = vmatmul.f32.vlgmr.msra.gmra.mxu1 %v315_v36 }
 0x132   : > { %v353_v38 = vpop.f32.mrf.mxu1 }
 0x133   : > { %v354_v39 = vadd.f32 %v539_v37, %v353_v38 }
 0x135   : > { %v494_v40 = vmul.f32 -1.442695, %v354_v39 }
 0x137   : > { %542 = vpow2.f32 %v494_v40 }
 0x13d   : > { %v543_v41 = vpop.eup %542 }
 0x13e   : > { %v359_v42 = vadd.f32 1.0, %v543_v41 }
 0x140   : > { %544 = vrcp.f32 %v359_v42  ;;  %v371_v46 = vand.u32 2147483648, %v359_v42  ;;  %v369_v49 = vand.u32 2147483647, %v359_v42  ;;  %vm365_vm1 = vweird.f32 %v359_v42 }
 0x142   : > { %v372_v51 = vor.u32 1.1754944e-38, %v371_v46  ;;  %vm370_vm3 = vcmp.eq.f32.partialorder %v369_v49, 8.507059e+37 }
 0x146   : > { %v545_v43 = vpop.eup %544 }
 0x147   : > { %v361_v44 = vmul.f32 %v545_v43, %v359_v42  ;;  %vm366_vm0 = vweird.f32 %v545_v43 }
 0x148   : > { %vm367_vm2 = vmor %vm365_vm1, %vm366_vm0 }
 0x149   : > { %v362_v45 = vsub.f32 1.0, %v361_v44 }
 0x14b   : > { %v363_v48 = vmul.f32 %v545_v43, %v362_v45 }
 0x14d   : > { %v364_v50 = vadd.f32 %v545_v43, %v363_v48 }
 0x14f   : > { %v368_v53 = vsel %vm367_vm2, %v545_v43, %v364_v50 }
 0x150   : > { %v373_v54 = vsel %vm370_vm3, %v372_v51, %v368_v53 }
 0x151   : > { %v375_v55 = vmul.f32 %v373_v54, %v354_v39 }
 0x153   : > { %v376_v56 = vadd.f32 %v375_v55, %v274_v29 }
 0x155   : > { %v380_v57 = vsel %vm379_vm4, %v376_v56, 0.0 }
 0x156   : > { %381 = vadd.xlane.f32.xlu0 %v380_v57 }
 0x1c9   : > { %v382_v58 = vpop.xlane.xlu0 %381 }
 0x1ca   : > { %v383_v59 = vmul.f32 0.03125, %v382_v58 }
 0x1cc   : > { %v384_v60 = vsub.f32 %v380_v57, %v383_v59 }
 0x1ce   : > { %v385_v61 = vsel %vm379_vm4, %v384_v60, 0.0 }
 0x1cf   : > { %v386_v62 = vmul.f32 %v385_v61, %v385_v61 }
 0x1d1   : > { %387 = vadd.xlane.f32.xlu0 %v386_v62 }
 0x244   : > { %v388_v63 = vpop.xlane.xlu0 %387 }
 0x245   : > { %v389_v0 = vmul.f32 0.03125, %v388_v63 }
 0x247   : > { %v390_v1 = vadd.f32 1e-05, %v389_v0 }
 0x249   : > { %546 = vrsqrt.f32 %v390_v1  ;;  %vm397_vm6 = vweird.f32 %v390_v1 }
 0x24f   : > { %v547_v2 = vpop.eup %546 }
 0x250   : > { %v392_v3 = vmul.f32 %v547_v2, %v390_v1  ;;  %vm398_vm5 = vweird.f32 %v547_v2 }
 0x251   : > { %vm399_vm7 = vmor %vm397_vm6, %vm398_vm5 }
 0x252   : > { %v393_v4 = vmul.f32 %v547_v2, %v392_v3 }
 0x254   : > { %v394_v5 = vmul.f32 0.5, %v393_v4 }
 0x256   : > { %v395_v6 = vsub.f32 1.5, %v394_v5 }
 0x258   : > { %v396_v7 = vmul.f32 %v547_v2, %v395_v6 }
 0x25a   : > { %v400_v9 = vsel %vm399_vm7, %v547_v2, %v396_v7 }
 0x25b   : > { %v401_v10 = vmul.f32 %v400_v9, %v385_v61 }
 0x25d   : > { %v406_v12 = vmul.f32 %v540_v8, %v401_v10 }
 0x25f   : > { %v411_v13 = vadd.f32 %v541_v11, %v406_v12 }
 0x261   : > { %412 = vst [vmem:[%s269_s13] sm:$0xff] %v411_v13 }
 0x262   : > { %575 = shalt.err (!%p572_p3)
}
 0x263   : > { %499 = dma.vmem_to_hbm [thread:$0]  (%p690_p5), %s427_s28, 128, %s429_s14, %s414_s23  }
 0x264 PF: > { %p505_p4 = scmp.ge.s32.totalorder %s610_s27, 2  ;;  %s440_s16 = sand.u32 1, %s598_s24  }
 0x265   : > { %s441_s29 = scalar_lea.sflag [#allocation3], %s440_s16 }
 0x266   : > { %p502_p7 = pnand %p505_p4, %p694_p6 }
 0x268   : > { %p503_p8 = pneg %p502_p7 }
 0x26a   : > { %593 = dma.done.wait (%p503_p8), %s441_s29, 128  }
 0x26b   : > { %595 = vsyncadd (%p503_p8), %s441_s29, 4294967168  ;;  %p17_p9 = scmp.ge.s32.totalorder %s677_s30, 4   ;;  %s855_s24 = smov %s602_s25 }
 0x26c   : > { %s856_s25 = smov %s606_s26  ;;  %s857_s26 = smov %s688_s10 }
 0x26d   : > { %s858_s27 = smov %s677_s30  ;;  %19 = sbr.rel (!%p17_p9) target bundleno = 3 (0x3), region = 83 }
 0x272   :  { %447 = vsyncpa [#allocation3], 1 }
 0x273   :  { %449 = vsyncpa [#allocation3 + $0x1], 1 }

</bundles_post_ra>
